<compile_context>
chip_gen: v7x
topology: tpu7x:2x2x1
jax: 0.10.0
libtpu: 0.0.40
codegen_flags: <defaults>
</compile_context>

<pallas_src>
import math

import jax
import jax.numpy as jnp
from jax.experimental import pallas as pl
from jax.experimental.pallas import tpu as pltpu


_MAX_INFLIGHT_DMAS = 8          # concurrent HBM->HBM slab copies
_MIN_SLAB_BYTES = 8 << 20       # don't bother chunking below ~8 MiB per slab
_MAX_COLS = 16384               # lane-dense slab width cap (elements)


def flatten(x: jax.Array) -> jax.Array:
    """Pallas equivalent of torch Flatten: x.reshape(x.shape[0], -1)."""
    B = x.shape[0]
    flat = math.prod(x.shape[1:]) if x.ndim > 1 else 1
    total = B * flat

    # Degenerate (empty) tensors: reshape is purely metadata, no kernel needed.
    if total == 0:
        return jnp.reshape(x, (B, flat))

    itemsize = jnp.dtype(x.dtype).itemsize

    # Present the buffer as a dense (rows, cols) slab.  cols is the largest
    # power-of-two multiple of 128 (<= _MAX_COLS) dividing the element count,
    # so row slabs are contiguous, lane-dense DMA regions.  Fall back to the
    # logical (B, flat) shape when total isn't a multiple of 128.
    if total % 128 == 0:
        cols = 128
        while cols * 2 <= _MAX_COLS and total % (cols * 2) == 0:
            cols *= 2
        rows = total // cols
    else:
        rows, cols = B, flat
    x2 = jnp.reshape(x, (rows, cols))            # metadata-only

    # Chunk the rows into at most _MAX_INFLIGHT_DMAS contiguous slabs of
    # roughly >= _MIN_SLAB_BYTES each, with slab starts aligned to the 8-row
    # sublane tile.  Small inputs collapse to a single full-array DMA.
    row_bytes = max(cols * itemsize, 1)
    min_rows = max(1, _MIN_SLAB_BYTES // row_bytes)
    n_chunks = max(1, min(_MAX_INFLIGHT_DMAS, rows // min_rows))
    chunk_rows = -(-rows // n_chunks)            # cdiv
    chunk_rows = -(-chunk_rows // 8) * 8         # sublane-align slab starts
    bounds = []
    r = 0
    while r < rows:
        sz = min(chunk_rows, rows - r)
        bounds.append((r, sz))
        r += sz
    n_slabs = len(bounds)

    def kernel(x_hbm, o_hbm, sems):
        # Issue every slab copy, then wait: all DMAs stream concurrently,
        # straight HBM -> HBM, never touching VMEM.
        copies = []
        for i, (start, size) in enumerate(bounds):
            if start == 0 and size == rows:
                src, dst = x_hbm, o_hbm              # whole-array copy
            else:
                src = x_hbm.at[pl.ds(start, size)]
                dst = o_hbm.at[pl.ds(start, size)]
            cp = pltpu.make_async_copy(src, dst, sems.at[i])
            cp.start()
            copies.append(cp)
        for cp in copies:
            cp.wait()

    out2 = pl.pallas_call(
        kernel,
        out_shape=jax.ShapeDtypeStruct((rows, cols), x.dtype),
        in_specs=[pl.BlockSpec(memory_space=pl.ANY)],
        out_specs=pl.BlockSpec(memory_space=pl.ANY),
        scratch_shapes=[pltpu.SemaphoreType.DMA((n_slabs,))],
    )(x2)

    return jnp.reshape(out2, (B, flat))          # metadata-only


if __name__ == "__main__":
    key = jax.random.PRNGKey(0)
    # Small NCHW input consistent with the module's forward: B=2, C=4, H=W=16.
    x = jax.random.normal(key, (2, 4, 16, 16), dtype=jnp.float32)

    out = flatten(x)
    jax.block_until_ready(out)

    # Check against plain-JAX reference (same semantics as torch reshape).
    ref = x.reshape(x.shape[0], -1)
    assert out.shape == (2, 4 * 16 * 16)
    assert out.dtype == x.dtype
    assert jnp.array_equal(out, ref)

    print("KERNEL_OK")
</pallas_src>

<mosaic_0001>
module attributes {stable_mosaic.version = 11 : i64} {
  func.func @kernel(%arg0: memref<1x2048xf32, #tpu.memory_space<any>>, %arg1: memref<1x2048xf32, #tpu.memory_space<any>>, %arg2: memref<1x!tpu.dma_semaphore, #tpu.memory_space<semaphore_mem>>) attributes {dimension_semantics = [], scalar_prefetch = 0 : i64, scratch_operands = 1 : i64, tpu.core_type = #tpu.core_type<tc>} {
    %c0_i32 = arith.constant 0 : i32
    %0 = tpu.memref_slice %arg2[%c0_i32] : memref<1x!tpu.dma_semaphore, #tpu.memory_space<semaphore_mem>> -> memref<1x!tpu.dma_semaphore, #tpu.memory_space<semaphore_mem>>
    %1 = tpu.memref_squeeze %0 : memref<1x!tpu.dma_semaphore, #tpu.memory_space<semaphore_mem>> -> memref<!tpu.dma_semaphore, #tpu.memory_space<semaphore_mem>>
    tpu.enqueue_dma source(%arg0 : memref<1x2048xf32, #tpu.memory_space<any>>) target(%arg1 : memref<1x2048xf32, #tpu.memory_space<any>>) target_semaphore(%1 : memref<!tpu.dma_semaphore, #tpu.memory_space<semaphore_mem>>)
    %c0_i32_0 = arith.constant 0 : i32
    %2 = tpu.memref_slice %arg2[%c0_i32_0] : memref<1x!tpu.dma_semaphore, #tpu.memory_space<semaphore_mem>> -> memref<1x!tpu.dma_semaphore, #tpu.memory_space<semaphore_mem>>
    %3 = tpu.memref_squeeze %2 : memref<1x!tpu.dma_semaphore, #tpu.memory_space<semaphore_mem>> -> memref<!tpu.dma_semaphore, #tpu.memory_space<semaphore_mem>>
    tpu.wait_dma2 semaphore(%3 : memref<!tpu.dma_semaphore, #tpu.memory_space<semaphore_mem>>) src(%arg0 : memref<1x2048xf32, #tpu.memory_space<any>>) dst(%arg1 : memref<1x2048xf32, #tpu.memory_space<any>>)
    return
  }
}

</mosaic_0001>

<bundles_post_ra>
// kernel: tpu_custom_call.1
= control target key start
LH: loop header
LB: loop body
LE: loop exit
PB: predicated region body
PF: predicated region fallthrough
CT: control target
= control target key end

     0   :  { %s34_s6 = smov [#allocation2]   ;;  %s35_s7 = smov [#allocation3]   ;;  %s53_s0 = inlined_call_operand.hbm [shape: f32[1,2048], index: 0, kind: input, shape index: {}]   ;;  %s54_s1 = inlined_call_operand.hbm [shape: f32[1,2048], index: 1, kind: output, shape index: {}]  }
   0x1   :  { %s36_s8 = smov 0  }
   0x2   :  { %18 = dma.general %s53_s0, 256, %s54_s1, %s34_s6, %s35_s7, [#allocation4], %s36_s8, 0  }
   0x3   :  { %32 = dma.done.wait [#allocation2], 256 }
   0x4   :  { %33 = vsyncadd [#allocation2], 4294967040 }
   0x5   :  { %22 = vsyncmov [#allocation2] }
   0x8   :  { %s23_s13 = vpop.sfrf %22 }
   0x9   :  { %p28_p0 = scmp.ne.s32.totalorder %s23_s13, 0 }
   0xb   :  { %27 = shalt.err (%p28_p0)  }

</bundles_post_ra>
